<compile_context>
chip_gen: v6e
topology: v6e:2x2x1
jax: 0.10.0
libtpu: 0.0.40
codegen_flags: <defaults>
</compile_context>

<pallas_src>
import functools

import jax
import jax.numpy as jnp
from jax.experimental import pallas as pl
from jax.experimental.pallas import tpu as pltpu

LANE = 128


def _round_up(x, m):
    return (x + m - 1) // m * m


def _multi_tensorcore():
    """True on chips with >1 TensorCore (v7x); conservative fallback False."""
    try:
        return "v7" in jax.devices()[0].device_kind.lower()
    except Exception:
        return False


def _vanet_kernel(x_ref, w_ref, b_ref, q_ref, *, dims):
    h0, h1, adim, r1, r2 = dims
    mm_dtype = w_ref.dtype

    x = x_ref[...]                            # [TB, r1] bf16; col state_dim == 1.0

    # Static, tile-aligned slices of the resident packed weight slab.
    w1 = w_ref[0:r1, 0:h0]                    # includes folded b1 row, zero pad rows
    w2 = w_ref[r1:r1 + h0, 0:h1]
    wh = w_ref[r1 + r2:r1 + r2 + h1, :]       # fused [WA | WV | 0...], full 128 lanes

    b2 = b_ref[:, 0:h1]                       # f32 biases
    bh = b_ref[:, LANE:2 * LANE]              # [bA | bV | 0...], full 128 lanes

    # Layer 1: Linear + ReLU (bias folded into the matmul via the ones column).
    h = jnp.dot(x, w1, preferred_element_type=jnp.float32)
    h = jnp.maximum(h, 0.0)

    # Layer 2: Linear + LeakyReLU (PyTorch default negative_slope = 0.01).
    h = jnp.dot(h.astype(mm_dtype), w2, preferred_element_type=jnp.float32) + b2
    h = jnp.where(h >= 0.0, h, 0.01 * h)

    # Fused dueling heads: one matmul over the full 128-lane block -> [A | V | junk].
    av = jnp.dot(h.astype(mm_dtype), wh, preferred_element_type=jnp.float32) + bh
    a = av[:, 0:adim]
    v = av[:, adim:adim + 1]

    # Q = V + A - mean(A), computed lane-dense across all 128 lanes (columns
    # >= adim are don't-care and sliced off in the wrapper) -> unmasked stores.
    q_ref[...] = av + (v - jnp.mean(a, axis=1, keepdims=True))


def pack_vanet_params(params, state_dim, hidden_dim, action_dim,
                      dtype=jnp.bfloat16):
    """Pack (W1,b1,W2,b2,WA,bA,WV,bV) into one weight slab + one bias row.

    Weights live in a [R, 128] slab (row offsets padded to multiples of 32 so
    slices stay sublane-aligned for both f32 and bf16). b1 is folded into an
    extra row of the W1 block (consumed by a ones column appended to x). The
    A/V head weights are fused into one [h1, action_dim+1] block. b2 and the
    head biases are packed f32 into a single [1, 2*128] row.
    """
    w1, b1, w2, b2, wa, ba, wv, bv = params
    h0, h1 = hidden_dim[0], hidden_dim[-1]
    assert max(h0, h1, action_dim + 1) <= LANE, "pack assumes feature dims <= 128"

    r1 = _round_up(state_dim + 1, 32)   # +1 row for the folded layer-1 bias
    r2 = _round_up(h0, 32)
    r3 = _round_up(h1, 32)

    wp = jnp.zeros((r1 + r2 + r3, LANE), jnp.float32)
    wp = wp.at[0:state_dim, 0:h0].set(w1)
    wp = wp.at[state_dim, 0:h0].set(b1.reshape(-1))          # folded b1 row
    wp = wp.at[r1:r1 + h0, 0:h1].set(w2)
    wp = wp.at[r1 + r2:r1 + r2 + h1, 0:action_dim + 1].set(
        jnp.concatenate([wa, wv], axis=1))
    wp = wp.astype(dtype)

    bp = jnp.zeros((1, 2 * LANE), jnp.float32)
    bp = bp.at[:, 0:h1].set(b2)
    bp = bp.at[:, LANE:LANE + action_dim].set(ba)
    bp = bp.at[:, LANE + action_dim:LANE + action_dim + 1].set(bv)

    dims = (h0, h1, action_dim, r1, r2)
    return wp, bp, dims


def vanet_forward(x, w_packed, b_packed, dims, *, block_b=1024):
    """Q = VAnet(x) with a batch-tiled Pallas kernel and resident weights."""
    h0, h1, adim, r1, r2 = dims
    batch, state_dim = x.shape
    dtype = w_packed.dtype

    # Tiling: one fat tile per TensorCore. Single step on 1-TC chips (v5e/v6e);
    # an even >=2-step grid on v7x so the "parallel" axis shards both cores.
    batch_p = _round_up(batch, 8)
    n_tiles = max(1, pl.cdiv(batch_p, block_b))
    if _multi_tensorcore() and batch_p >= 16:
        n_tiles = max(2, n_tiles + (n_tiles % 2))
    tb = _round_up(pl.cdiv(batch_p, n_tiles), 8)
    batch_p = _round_up(batch_p, tb)
    grid_steps = batch_p // tb

    # bf16 operands (halves x DMA bytes); ones column feeds the folded b1 row.
    xp = jnp.zeros((batch_p, r1), dtype)
    xp = xp.at[:batch, :state_dim].set(x.astype(dtype))
    xp = xp.at[:, state_dim].set(jnp.asarray(1.0, dtype))

    if grid_steps > 8:
        # Tiny, latency-bound x DMAs: deepen input pipelining on long grids.
        x_spec = pl.BlockSpec((tb, r1), lambda i: (i, 0),
                              pipeline_mode=pl.Buffered(3))
    else:
        x_spec = pl.BlockSpec((tb, r1), lambda i: (i, 0))

    kernel = functools.partial(_vanet_kernel, dims=dims)

    q = pl.pallas_call(
        kernel,
        out_shape=jax.ShapeDtypeStruct((batch_p, LANE), jnp.float32),
        grid_spec=pltpu.PrefetchScalarGridSpec(
            num_scalar_prefetch=0,
            grid=(grid_steps,),
            in_specs=[
                x_spec,
                pl.BlockSpec(w_packed.shape, lambda i: (0, 0)),  # resident
                pl.BlockSpec(b_packed.shape, lambda i: (0, 0)),  # resident
            ],
            out_specs=pl.BlockSpec((tb, LANE), lambda i: (i, 0)),
        ),
        compiler_params=pltpu.CompilerParams(
            dimension_semantics=("parallel",)),
    )(xp, w_packed, b_packed)

    # Padded batch rows / lanes >= adim are don't-care; keep this slice.
    return q[:batch, :adim]


def make_params(key, state_dim, hidden_dim, action_dim):
    """Deterministic synthetic parameters (no checkpoint load)."""
    ks = jax.random.split(key, 8)
    h0, h1 = hidden_dim[0], hidden_dim[-1]
    scale = 0.1
    w1 = scale * jax.random.normal(ks[0], (state_dim, h0), jnp.float32)
    b1 = scale * jax.random.normal(ks[1], (1, h0), jnp.float32)
    w2 = scale * jax.random.normal(ks[2], (h0, h1), jnp.float32)
    b2 = scale * jax.random.normal(ks[3], (1, h1), jnp.float32)
    wa = scale * jax.random.normal(ks[4], (h1, action_dim), jnp.float32)
    ba = scale * jax.random.normal(ks[5], (1, action_dim), jnp.float32)
    wv = scale * jax.random.normal(ks[6], (h1, 1), jnp.float32)
    bv = scale * jax.random.normal(ks[7], (1, 1), jnp.float32)
    return w1, b1, w2, b2, wa, ba, wv, bv


def reference_forward(x, params):
    w1, b1, w2, b2, wa, ba, wv, bv = params
    h = jnp.maximum(x @ w1 + b1, 0.0)
    h = h @ w2 + b2
    h = jnp.where(h >= 0.0, h, 0.01 * h)
    a = h @ wa + ba
    v = h @ wv + bv
    return v + a - jnp.mean(a, axis=1, keepdims=True)


if __name__ == "__main__":
    batch = 256
    state_dim = 16
    hidden_dim = [32, 32]
    action_dim = 8

    key = jax.random.PRNGKey(0)
    k_x, k_p = jax.random.split(key)
    x = jax.random.normal(k_x, (batch, state_dim), jnp.float32)
    params = make_params(k_p, state_dim, hidden_dim, action_dim)

    w_packed, b_packed, dims = pack_vanet_params(
        params, state_dim, hidden_dim, action_dim, dtype=jnp.bfloat16)

    q = vanet_forward(x, w_packed, b_packed, dims)   # default block_b=1024
    jax.block_until_ready(q)

    q_ref = reference_forward(x, params)  # f32 reference
    assert q.shape == (batch, action_dim)
    max_err = float(jnp.max(jnp.abs(q - q_ref)))
    # bf16 matmul operands (incl. folded b1) with f32 accumulation -> loosened tol.
    assert jnp.allclose(q, q_ref, atol=2e-2, rtol=2e-2), f"max err {max_err}"

    print("KERNEL_OK")
</pallas_src>

<mosaic_0001>
module attributes {stable_mosaic.version = 11 : i64} {
  func.func @_vanet_kernel(%arg0: i32, %arg1: memref<256x32xbf16, #tpu.memory_space<vmem>>, %arg2: memref<96x128xbf16, #tpu.memory_space<vmem>>, %arg3: memref<1x256xf32, #tpu.memory_space<vmem>>, %arg4: memref<256x128xf32, #tpu.memory_space<vmem>>) attributes {dimension_semantics = [#tpu.dimension_semantics<parallel>], iteration_bounds = array<i64: 1>, scalar_prefetch = 0 : i64, scratch_operands = 0 : i64, tpu.core_type = #tpu.core_type<tc>, window_params = [{transform_indices = @transform_0, window_bounds = array<i64: 256, 32>}, {pipeline_mode = #tpu.pipeline_mode<synchronous>, transform_indices = @transform_1, window_bounds = array<i64: 96, 128>}, {pipeline_mode = #tpu.pipeline_mode<synchronous>, transform_indices = @transform_2, window_bounds = array<i64: 1, 256>}, {transform_indices = @transform_3, window_bounds = array<i64: 256, 128>}]} {
    %c0 = arith.constant 0 : index
    %c0_0 = arith.constant 0 : index
    %0 = vector.load %arg1[%c0, %c0_0] : memref<256x32xbf16, #tpu.memory_space<vmem>>, vector<256x32xbf16>
    %c0_1 = arith.constant 0 : index
    %c0_2 = arith.constant 0 : index
    %1 = vector.load %arg2[%c0_1, %c0_2] : memref<96x128xbf16, #tpu.memory_space<vmem>>, vector<32x32xbf16>
    %c32 = arith.constant 32 : index
    %c0_3 = arith.constant 0 : index
    %2 = vector.load %arg2[%c32, %c0_3] : memref<96x128xbf16, #tpu.memory_space<vmem>>, vector<32x32xbf16>
    %c64 = arith.constant 64 : index
    %c0_4 = arith.constant 0 : index
    %3 = vector.load %arg2[%c64, %c0_4] : memref<96x128xbf16, #tpu.memory_space<vmem>>, vector<32x128xbf16>
    %c0_5 = arith.constant 0 : index
    %c0_6 = arith.constant 0 : index
    %4 = vector.load %arg3[%c0_5, %c0_6] : memref<1x256xf32, #tpu.memory_space<vmem>>, vector<1x32xf32>
    %c0_7 = arith.constant 0 : index
    %c128 = arith.constant 128 : index
    %5 = vector.load %arg3[%c0_7, %c128] : memref<1x256xf32, #tpu.memory_space<vmem>>, vector<1x128xf32>
    %cst = arith.constant dense<0.000000e+00> : vector<256x32xf32>
    %6 = tpu.matmul %0, %1, %cst {dimension_numbers = #tpu.dot_dimension_numbers<[1], [0], [0], [1], [0, 0, 1, 1], [], []>} : vector<256x32xbf16>, vector<32x32xbf16>, vector<256x32xf32> -> vector<256x32xf32>
    %cst_8 = arith.constant 0.000000e+00 : f32
    %7 = vector.broadcast %cst_8 : f32 to vector<256x32xf32>
    %8 = arith.maximumf %6, %7 : vector<256x32xf32>
    %9 = arith.truncf %8 : vector<256x32xf32> to vector<256x32xbf16>
    %cst_9 = arith.constant dense<0.000000e+00> : vector<256x32xf32>
    %10 = tpu.matmul %9, %2, %cst_9 {dimension_numbers = #tpu.dot_dimension_numbers<[1], [0], [0], [1], [0, 0, 1, 1], [], []>} : vector<256x32xbf16>, vector<32x32xbf16>, vector<256x32xf32> -> vector<256x32xf32>
    %11 = vector.broadcast %4 : vector<1x32xf32> to vector<256x32xf32>
    %12 = arith.addf %10, %11 : vector<256x32xf32>
    %cst_10 = arith.constant 0.000000e+00 : f32
    %13 = vector.broadcast %cst_10 : f32 to vector<256x32xf32>
    %14 = arith.cmpf oge, %12, %13 : vector<256x32xf32>
    %cst_11 = arith.constant 0.00999999977 : f32
    %15 = vector.broadcast %cst_11 : f32 to vector<256x32xf32>
    %16 = arith.mulf %15, %12 : vector<256x32xf32>
    %17 = arith.select %14, %12, %16 : vector<256x32xi1>, vector<256x32xf32>
    %18 = arith.truncf %17 : vector<256x32xf32> to vector<256x32xbf16>
    %cst_12 = arith.constant dense<0.000000e+00> : vector<256x128xf32>
    %19 = tpu.matmul %18, %3, %cst_12 {dimension_numbers = #tpu.dot_dimension_numbers<[1], [0], [0], [1], [0, 0, 1, 1], [], []>} : vector<256x32xbf16>, vector<32x128xbf16>, vector<256x128xf32> -> vector<256x128xf32>
    %20 = vector.broadcast %5 : vector<1x128xf32> to vector<256x128xf32>
    %21 = arith.addf %19, %20 : vector<256x128xf32>
    %22 = vector.extract_strided_slice %21 {offsets = [0, 0], sizes = [256, 8], strides = [1, 1]} : vector<256x128xf32> to vector<256x8xf32>
    %23 = vector.extract_strided_slice %21 {offsets = [0, 8], sizes = [256, 1], strides = [1, 1]} : vector<256x128xf32> to vector<256x1xf32>
    %cst_13 = arith.constant dense<0.000000e+00> : vector<256xf32>
    %24 = vector.multi_reduction <add>, %22, %cst_13 [1] : vector<256x8xf32> to vector<256xf32>
    %25 = vector.shape_cast %24 : vector<256xf32> to vector<256x1xf32>
    %cst_14 = arith.constant 8.000000e+00 : f32
    %26 = vector.broadcast %cst_14 : f32 to vector<256x1xf32>
    %27 = arith.divf %25, %26 : vector<256x1xf32>
    %28 = arith.subf %23, %27 : vector<256x1xf32>
    %29 = vector.broadcast %28 : vector<256x1xf32> to vector<256x128xf32>
    %30 = arith.addf %21, %29 : vector<256x128xf32>
    %c0_15 = arith.constant 0 : index
    %c0_16 = arith.constant 0 : index
    %31 = vector.load %arg4[%c0_15, %c0_16] : memref<256x128xf32, #tpu.memory_space<vmem>>, vector<256x128xf32>
    tpu.vector_store %arg4[%c0_15, %c0_16], %30 {strides = array<i32>} : memref<256x128xf32, #tpu.memory_space<vmem>>, vector<256x128xf32>,
    return
  }
  func.func @transform_0(%arg0: i32) -> (i32, i32) {
    %c0_i32 = arith.constant 0 : i32
    %c0_i32_0 = arith.constant 0 : i32
    return %arg0, %c0_i32 : i32, i32
  }
  func.func @transform_1(%arg0: i32) -> (i32, i32) {
    %c0_i32 = arith.constant 0 : i32
    %c0_i32_0 = arith.constant 0 : i32
    %c0_i32_1 = arith.constant 0 : i32
    return %c0_i32, %c0_i32_0 : i32, i32
  }
  func.func @transform_2(%arg0: i32) -> (i32, i32) {
    %c0_i32 = arith.constant 0 : i32
    %c0_i32_0 = arith.constant 0 : i32
    %c0_i32_1 = arith.constant 0 : i32
    return %c0_i32, %c0_i32_0 : i32, i32
  }
  func.func @transform_3(%arg0: i32) -> (i32, i32) {
    %c0_i32 = arith.constant 0 : i32
    %c0_i32_0 = arith.constant 0 : i32
    return %arg0, %c0_i32 : i32, i32
  }
}

</mosaic_0001>

<bundles_post_ra>
// kernel: tpu_custom_call.1
= control target key start
LH: loop header
LB: loop body
LE: loop exit
PB: predicated region body
PF: predicated region fallthrough
CT: control target
= control target key end

     0   :  { %vm154_vm0 = vcmask 261120   ;;  %s2081_s0 = inlined_call_operand.vmem [shape: bf16[256,32], index: 0, kind: input, shape index: {}]   ;;  %s2082_s1 = inlined_call_operand.vmem [shape: bf16[96,128], index: 1, kind: input, shape index: {}]   ;;  %s2083_s2 = inlined_call_operand.vmem [shape: f32[1,256], index: 2, kind: input, shape index: {}]   ;;  %s2084_s3 = inlined_call_operand.hbm [shape: f32[256,128], index: 3, kind: output, shape index: {}]  }
   0x1   :  { %v1624_v0 = vld [vmem:[%s2082_s1 + $0x8] sm:$0xff]   ;;  %v1625_v1 = vld [vmem:[%s2082_s1] sm:$0xff]   ;;  %v1628_v4 = vld [vmem:[%s2081_s0 + $0x10] sm:$0xff]  }
   0x2   :  { %1506 = vmatprep.subr.bf16.mxu0 %v1624_v0  ;;  %v1626_v2 = vld [vmem:[%s2081_s0] sm:$0xff]   ;;  %1614 = vmatprep.subr.bf16.mxu1 %v1624_v0  ;;  %v1627_v3 = vld [vmem:[%s2081_s0 + $0x8] sm:$0xff]   ;;  %v1636_v7 = vld [vmem:[%s2081_s0 + $0x50] sm:$0xff]  }
   0x3   :  { %1507 = vmatpush3.bf16.msra.mxu0 %v1624_v0  ;;  %1616 = vmatpush3.bf16.msra.mxu1 %v1624_v0  ;;  %v1634_v5 = vld [vmem:[%s2081_s0 + $0x40] sm:$0xff]   ;;  %v1635_v6 = vld [vmem:[%s2081_s0 + $0x48] sm:$0xff]   ;;  %v1629_v8 = vld [vmem:[%s2081_s0 + $0x18] sm:$0xff]  }
   0x4   :  { %1508 = vmatprep.subr.bf16.mxu0 %v1625_v1  ;;  %1510 = vmatprep.mubr.msk.bf16.mxu0 %vm154_vm0, %v1626_v2  ;;  %v1630_v9 = vld [vmem:[%s2081_s0 + $0x20] sm:$0xff]   ;;  %v1637_v10 = vld [vmem:[%s2081_s0 + $0x58] sm:$0xff]   ;;  %v1643_v13 = vld [vmem:[%s2082_s1 + $0x10] sm:$0xff]  }
   0x5   :  { %1615 = vmatprep.subr.bf16.mxu1 %v1625_v1  ;;  %1526 = vmatprep.mubr.msk.bf16.mxu1 %vm154_vm0, %v1634_v5  ;;  %v1638_v11 = vld [vmem:[%s2081_s0 + $0x60] sm:$0xff]   ;;  %v1642_v12 = vld [vmem:[%s2082_s1 + $0x18] sm:$0xff]  }
   0x7   :  { %1509 = vmatpush3.bf16.msra.mxu0 %v1625_v1  ;;  %1617 = vmatpush3.bf16.msra.mxu1 %v1625_v1 }
   0x8   :  { %1542 = vmatprep.subr.bf16.mxu1 %v1642_v12 }
   0xa   :  { %1511 = vmatmul.mubr.msk.bf16.vlgmr.msra.gmra.mxu0 %vm154_vm0, %v1627_v3  ;;  %1527 = vmatmul.mubr.msk.bf16.vlgmr.msra.gmra.mxu1 %vm154_vm0, %v1635_v6 }
   0xb   :  { %1514 = vmatprep.mubr.msk.bf16.mxu0 %vm154_vm0, %v1628_v4  ;;  %1530 = vmatprep.mubr.msk.bf16.mxu1 %vm154_vm0, %v1636_v7 }
  0x12   :  { %1515 = vmatmul.mubr.msk.bf16.gmra.mxu0 %vm154_vm0, %v1629_v8  ;;  %1531 = vmatmul.mubr.msk.bf16.gmra.mxu1 %vm154_vm0, %v1637_v10 }
  0x13   :  { %1518 = vmatprep.mubr.msk.bf16.mxu0 %vm154_vm0, %v1630_v9 }
  0x14   :  { %8 = vsyncpa [#allocation3], 0  ;;  %v1631_v14 = vld [vmem:[%s2081_s0 + $0x28] sm:$0xff]   ;;  %1534 = vmatprep.mubr.msk.bf16.mxu1 %vm154_vm0, %v1638_v11  ;;  %1543 = vmatpush3.bf16.msra.mxu1 %v1642_v12  ;;  %v1632_v15 = vld [vmem:[%s2081_s0 + $0x30] sm:$0xff]  }
  0x15   :  { %1544 = vmatprep.subr.bf16.mxu1 %v1643_v13  ;;  %v1639_v16 = vld [vmem:[%s2081_s0 + $0x68] sm:$0xff]   ;;  %v1640_v17 = vld [vmem:[%s2081_s0 + $0x70] sm:$0xff]   ;;  %v1633_v18 = vld [vmem:[%s2081_s0 + $0x38] sm:$0xff]  }
  0x16   :  { %v1641_v19 = vld [vmem:[%s2081_s0 + $0x78] sm:$0xff]   ;;  %v1644_v20 = vld [vmem:[%s2082_s1 + $0x28] sm:$0xff]   ;;  %v1645_v21 = vld [vmem:[%s2082_s1 + $0x20] sm:$0xff]  }
  0x17   :  { %1578 = vmatprep.subr.bf16.mxu0 %v1644_v20 }
  0x18   :  { %1545 = vmatpush3.bf16.msra.mxu1 %v1643_v13  ;;  %1579 = vmatpush3.bf16.msra.mxu0 %v1644_v20 }
  0x19   :  { %1580 = vmatprep.subr.bf16.mxu0 %v1645_v21 }
  0x1a   :  { %1519 = vmatmul.mubr.msk.bf16.gmra.mxu0 %vm154_vm0, %v1631_v14  ;;  %1535 = vmatmul.mubr.msk.bf16.gmra.mxu1 %vm154_vm0, %v1639_v16 }
  0x1b   :  { %1522 = vmatprep.mubr.msk.bf16.mxu0 %vm154_vm0, %v1632_v15  ;;  %1538 = vmatprep.mubr.msk.bf16.mxu1 %vm154_vm0, %v1640_v17 }
  0x1c   :  { %1581 = vmatpush3.bf16.msra.mxu0 %v1645_v21 }
  0x22   :  { %1523 = vmatmul.mubr.msk.bf16.gmra.mxu0 %vm154_vm0, %v1633_v18  ;;  %1539 = vmatmul.mubr.msk.bf16.gmra.mxu1 %vm154_vm0, %v1641_v19 }
  0xca   :  { %v1512_v22 = vpop.f32.mrf.mxu0  ;;  %v1774_v24 = vpop.f32.mrf.mxu1 }
  0xcb   :  { %v366_v32 = vmax.f32 %v1512_v22, 0.0  ;;  %v382_v15 = vmax.f32 %v1774_v24, 0.0 }
  0xcc   :  { %v237_v23 = vpop.f32.mrf.mxu0  ;;  %v301_v26 = vpop.f32.mrf.mxu1 }
  0xcd   :  { %v364_v29 = vmax.f32 %v237_v23, 0.0  ;;  %v380_v1 = vmax.f32 %v301_v26, 0.0 }
  0xce   :  { %v1513_v25 = vpop.f32.mrf.mxu0  ;;  %v1529_v31 = vpop.f32.mrf.mxu1 }
  0xcf   :  { %v367_v27 = vmax.f32 %v1513_v25, 0.0  ;;  %v383_v16 = vmax.f32 %v1529_v31, 0.0 }
  0xd0   :  { %v240_v28 = vpop.f32.mrf.mxu0  ;;  %v304_v35 = vpop.f32.mrf.mxu1 }
  0xd1   :  { %v365_v30 = vmax.f32 %v240_v28, 0.0  ;;  %v397_v36 = vpack.c.bf16 %v367_v27, %v366_v32  ;;  %v381_v2 = vmax.f32 %v304_v35, 0.0  ;;  %v405_v19 = vpack.c.bf16 %v383_v16, %v382_v15 }
  0xd2   :  { %v1516_v33 = vpop.f32.mrf.mxu0  ;;  %v1777_v38 = vpop.f32.mrf.mxu1 }
  0xd3   :  { %v396_v34 = vpack.c.bf16 %v365_v30, %v364_v29  ;;  %v370_v41 = vmax.f32 %v1516_v33, 0.0  ;;  %v404_v10 = vpack.c.bf16 %v381_v2, %v380_v1  ;;  %v386_v23 = vmax.f32 %v1777_v38, 0.0 }
  0xd4   :  { %v253_v37 = vpop.f32.mrf.mxu0  ;;  %v317_v40 = vpop.f32.mrf.mxu1 }
  0xd5   :  { %1546 = vmatprep.mubr.msk.bf16.mxu1 %vm154_vm0, %v396_v34  ;;  %v368_v44 = vmax.f32 %v253_v37, 0.0  ;;  %v384_v13 = vmax.f32 %v317_v40, 0.0 }
  0xd6   :  { %v1517_v39 = vpop.f32.mrf.mxu0  ;;  %1547 = vmatmul.mubr.msk.bf16.vlgmr.msra.gmra.mxu1 %vm154_vm0, %v397_v36  ;;  %v1533_v46 = vpop.f32.mrf.mxu1 }
  0xd7   :  { %v371_v42 = vmax.f32 %v1517_v39, 0.0  ;;  %v387_v25 = vmax.f32 %v1533_v46, 0.0  ;;  %v1799_v39 = vld [vmem:[%s2083_s2] ss:$0 sm:$0xff] }
  0xd8   :  { %v256_v43 = vpop.f32.mrf.mxu0  ;;  %v320_v51 = vpop.f32.mrf.mxu1 }
  0xd9   :  { %v369_v45 = vmax.f32 %v256_v43, 0.0  ;;  %v399_v49 = vpack.c.bf16 %v371_v42, %v370_v41  ;;  %v385_v14 = vmax.f32 %v320_v51, 0.0  ;;  %v407_v28 = vpack.c.bf16 %v387_v25, %v386_v23 }
  0xda   :  { %v1520_v47 = vpop.f32.mrf.mxu0  ;;  %v1536_v56 = vpop.f32.mrf.mxu1 }
  0xdb   :  { %v398_v48 = vpack.c.bf16 %v369_v45, %v368_v44  ;;  %v374_v53 = vmax.f32 %v1520_v47, 0.0  ;;  %v406_v18 = vpack.c.bf16 %v385_v14, %v384_v13  ;;  %v390_v31 = vmax.f32 %v1536_v56, 0.0 }
  0xdc   :  { %v269_v50 = vpop.f32.mrf.mxu0  ;;  %v333_v63 = vpop.f32.mrf.mxu1 }
  0xdd   :  { %1550 = vmatprep.mubr.msk.bf16.mxu1 %vm154_vm0, %v398_v48  ;;  %v372_v57 = vmax.f32 %v269_v50, 0.0  ;;  %v388_v21 = vmax.f32 %v333_v63, 0.0 }
  0xde   :  { %v1521_v52 = vpop.f32.mrf.mxu0  ;;  %1551 = vmatmul.mubr.msk.bf16.gmra.mxu1 %vm154_vm0, %v399_v49  ;;  %v1537_v6 = vpop.f32.mrf.mxu1 }
  0xdf   :  { %v375_v54 = vmax.f32 %v1521_v52, 0.0  ;;  %v391_v32 = vmax.f32 %v1537_v6, 0.0 }
  0xe0   :  { %v272_v55 = vpop.f32.mrf.mxu0  ;;  %v336_v12 = vpop.f32.mrf.mxu1 }
  0xe1   :  { %v373_v58 = vmax.f32 %v272_v55, 0.0  ;;  %v401_v61 = vpack.c.bf16 %v375_v54, %v374_v53  ;;  %v389_v22 = vmax.f32 %v336_v12, 0.0  ;;  %v409_v34 = vpack.c.bf16 %v391_v32, %v390_v31 }
  0xe2   :  { %v1524_v59 = vpop.f32.mrf.mxu0  ;;  %v1540_v17 = vpop.f32.mrf.mxu1 }
  0xe3   :  { %v400_v60 = vpack.c.bf16 %v373_v58, %v372_v57  ;;  %v378_v3 = vmax.f32 %v1524_v59, 0.0  ;;  %v408_v27 = vpack.c.bf16 %v389_v22, %v388_v21  ;;  %v394_v35 = vmax.f32 %v1540_v17, 0.0 }
  0xe4   :  { %v285_v62 = vpop.f32.mrf.mxu0  ;;  %v349_v20 = vpop.f32.mrf.mxu1 }
  0xe5   :  { %1554 = vmatprep.mubr.msk.bf16.mxu1 %vm154_vm0, %v400_v60  ;;  %v376_v7 = vmax.f32 %v285_v62, 0.0  ;;  %v392_v24 = vmax.f32 %v349_v20, 0.0 }
  0xe6   :  { %v1525_v0 = vpop.f32.mrf.mxu0  ;;  %1555 = vmatmul.mubr.msk.bf16.gmra.mxu1 %vm154_vm0, %v401_v61  ;;  %v1541_v26 = vpop.f32.mrf.mxu1 }
  0xe7   :  { %v379_v4 = vmax.f32 %v1525_v0, 0.0  ;;  %v395_v36 = vmax.f32 %v1541_v26, 0.0 }
  0xe8   :  { %v288_v5 = vpop.f32.mrf.mxu0  ;;  %v352_v29 = vpop.f32.mrf.mxu1 }
  0xe9   :  { %v377_v8 = vmax.f32 %v288_v5, 0.0  ;;  %v403_v11 = vpack.c.bf16 %v379_v4, %v378_v3  ;;  %v393_v30 = vmax.f32 %v352_v29, 0.0  ;;  %v411_v37 = vpack.c.bf16 %v395_v36, %v394_v35 }
  0xeb   :  { %v402_v9 = vpack.c.bf16 %v377_v8, %v376_v7  ;;  %v410_v33 = vpack.c.bf16 %v393_v30, %v392_v24 }
  0xed   :  { %1558 = vmatprep.mubr.msk.bf16.mxu1 %vm154_vm0, %v402_v9 }
  0xee   :  { %1559 = vmatmul.mubr.msk.bf16.gmra.mxu1 %vm154_vm0, %v403_v11 }
  0xef   :  { %1562 = vmatprep.mubr.msk.bf16.mxu1 %vm154_vm0, %v404_v10 }
  0xf6   :  { %1563 = vmatmul.mubr.msk.bf16.gmra.mxu1 %vm154_vm0, %v405_v19 }
  0xf7   :  { %1566 = vmatprep.mubr.msk.bf16.mxu1 %vm154_vm0, %v406_v18 }
  0xfe   :  { %1567 = vmatmul.mubr.msk.bf16.gmra.mxu1 %vm154_vm0, %v407_v28 }
  0xff   :  { %1570 = vmatprep.mubr.msk.bf16.mxu1 %vm154_vm0, %v408_v27 }
 0x106   :  { %1571 = vmatmul.mubr.msk.bf16.gmra.mxu1 %vm154_vm0, %v409_v34 }
 0x107   :  { %1574 = vmatprep.mubr.msk.bf16.mxu1 %vm154_vm0, %v410_v33 }
 0x10e   :  { %1575 = vmatmul.mubr.msk.bf16.gmra.mxu1 %vm154_vm0, %v411_v37 }
 0x196   :  { %v1548_v38 = vpop.f32.mrf.mxu1 }
 0x197   :  { %v521_v42 = vadd.f32 %v1548_v38, %v1799_v39 }
 0x198   :  { %v512_v40 = vpop.f32.mrf.mxu1 }
 0x199   :  { %v513_v41 = vadd.f32 %v1799_v39, %v512_v40  ;;  %v673_v49 = vmul.f32 0.01, %v521_v42  ;;  %vm641_vm3 = vcmp.ge.f32.partialorder %v521_v42, 0.0 }
 0x19a   :  { %v1549_v43 = vpop.f32.mrf.mxu1 }
 0x19b   :  { %v524_v44 = vadd.f32 %v1549_v43, %v1799_v39  ;;  %v671_v46 = vmul.f32 0.01, %v513_v41  ;;  %vm639_vm2 = vcmp.ge.f32.partialorder %v513_v41, 0.0  ;;  %v705_v57 = vsel %vm641_vm3, %v521_v42, %v673_v49 }
 0x19c   :  { %v515_v45 = vpop.f32.mrf.mxu1 }
 0x19d   :  { %vm642_vm1 = vcmp.ge.f32.partialorder %v524_v44, 0.0  ;;  %v674_v47 = vmul.f32 0.01, %v524_v44  ;;  %v516_v48 = vadd.f32 %v1799_v39, %v515_v45  ;;  %v703_v54 = vsel %vm639_vm2, %v513_v41, %v671_v46 }
 0x19e   :  { %v1552_v50 = vpop.f32.mrf.mxu1 }
 0x19f   :  { %vm640_vm4 = vcmp.ge.f32.partialorder %v516_v48, 0.0  ;;  %v672_v51 = vmul.f32 0.01, %v516_v48  ;;  %v706_v52 = vsel %vm642_vm1, %v524_v44, %v674_v47  ;;  %v537_v59 = vadd.f32 %v1552_v50, %v1799_v39 }
 0x1a0   :  { %v528_v53 = vpop.f32.mrf.mxu1  ;;  %v736_v61 = vpack.c.bf16 %v706_v52, %v705_v57 }
 0x1a1   :  { %v704_v55 = vsel %vm640_vm4, %v516_v48, %v672_v51  ;;  %v529_v56 = vadd.f32 %v1799_v39, %v528_v53  ;;  %v677_v3 = vmul.f32 0.01, %v537_v59  ;;  %vm645_vm7 = vcmp.ge.f32.partialorder %v537_v59, 0.0 }
 0x1a2   :  { %v735_v58 = vpack.c.bf16 %v704_v55, %v703_v54  ;;  %v1553_v60 = vpop.f32.mrf.mxu1 }
 0x1a3   :  { %v540_v62 = vadd.f32 %v1553_v60, %v1799_v39  ;;  %v675_v0 = vmul.f32 0.01, %v529_v56  ;;  %vm643_vm6 = vcmp.ge.f32.partialorder %v529_v56, 0.0  ;;  %v709_v11 = vsel %vm645_vm7, %v537_v59, %v677_v3 }
 0x1a4   :  { %v531_v63 = vpop.f32.mrf.mxu1  ;;  %1582 = vmatprep.mubr.msk.bf16.mxu0 %vm154_vm0, %v735_v58 }
 0x1a5   :  { %vm646_vm5 = vcmp.ge.f32.partialorder %v540_v62, 0.0  ;;  %v678_v1 = vmul.f32 0.01, %v540_v62  ;;  %v532_v2 = vadd.f32 %v1799_v39, %v531_v63  ;;  %1583 = vmatmul.mubr.msk.bf16.vlgmr.msra.gmra.mxu0 %vm154_vm0, %v736_v61  ;;  %v707_v8 = vsel %vm643_vm6, %v529_v56, %v675_v0 }
 0x1a6   :  { %v1556_v4 = vpop.f32.mrf.mxu1 }
 0x1a7   :  { %vm644_vm8 = vcmp.ge.f32.partialorder %v532_v2, 0.0  ;;  %v676_v5 = vmul.f32 0.01, %v532_v2  ;;  %v710_v6 = vsel %vm646_vm5, %v540_v62, %v678_v1  ;;  %v553_v13 = vadd.f32 %v1556_v4, %v1799_v39 }
 0x1a8   :  { %v544_v7 = vpop.f32.mrf.mxu1  ;;  %v738_v15 = vpack.c.bf16 %v710_v6, %v709_v11 }
 0x1a9   :  { %v708_v9 = vsel %vm644_vm8, %v532_v2, %v676_v5  ;;  %v545_v10 = vadd.f32 %v1799_v39, %v544_v7  ;;  %v681_v21 = vmul.f32 0.01, %v553_v13  ;;  %vm649_vm11 = vcmp.ge.f32.partialorder %v553_v13, 0.0 }
 0x1aa   :  { %v737_v12 = vpack.c.bf16 %v708_v9, %v707_v8  ;;  %v1557_v14 = vpop.f32.mrf.mxu1 }
 0x1ab   :  { %v556_v16 = vadd.f32 %v1557_v14, %v1799_v39  ;;  %v679_v18 = vmul.f32 0.01, %v545_v10  ;;  %vm647_vm10 = vcmp.ge.f32.partialorder %v545_v10, 0.0  ;;  %v713_v24 = vsel %vm649_vm11, %v553_v13, %v681_v21 }
 0x1ac   :  { %v547_v17 = vpop.f32.mrf.mxu1  ;;  %1586 = vmatprep.mubr.msk.bf16.mxu0 %vm154_vm0, %v737_v12 }
 0x1ad   :  { %vm650_vm9 = vcmp.ge.f32.partialorder %v556_v16, 0.0  ;;  %v682_v19 = vmul.f32 0.01, %v556_v16  ;;  %v548_v20 = vadd.f32 %v1799_v39, %v547_v17  ;;  %1587 = vmatmul.mubr.msk.bf16.gmra.mxu0 %vm154_vm0, %v738_v15  ;;  %v711_v27 = vsel %vm647_vm10, %v545_v10, %v679_v18 }
 0x1ae   :  { %v1560_v22 = vpop.f32.mrf.mxu1 }
 0x1af   :  { %vm648_vm12 = vcmp.ge.f32.partialorder %v548_v20, 0.0  ;;  %v680_v23 = vmul.f32 0.01, %v548_v20  ;;  %v714_v25 = vsel %vm650_vm9, %v556_v16, %v682_v19  ;;  %v569_v31 = vadd.f32 %v1560_v22, %v1799_v39 }
 0x1b0   :  { %v560_v26 = vpop.f32.mrf.mxu1  ;;  %v740_v33 = vpack.c.bf16 %v714_v25, %v713_v24 }
 0x1b1   :  { %v712_v28 = vsel %vm648_vm12, %v548_v20, %v680_v23  ;;  %v561_v29 = vadd.f32 %v1799_v39, %v560_v26  ;;  %v685_v40 = vmul.f32 0.01, %v569_v31  ;;  %vm653_vm15 = vcmp.ge.f32.partialorder %v569_v31, 0.0 }
 0x1b2   :  { %v739_v30 = vpack.c.bf16 %v712_v28, %v711_v27  ;;  %v1561_v32 = vpop.f32.mrf.mxu1 }
 0x1b3   :  { %v572_v34 = vadd.f32 %v1561_v32, %v1799_v39  ;;  %v683_v36 = vmul.f32 0.01, %v561_v29  ;;  %vm651_vm14 = vcmp.ge.f32.partialorder %v561_v29, 0.0  ;;  %v717_v48 = vsel %vm653_vm15, %v569_v31, %v685_v40 }
 0x1b4   :  { %v563_v35 = vpop.f32.mrf.mxu1  ;;  %1590 = vmatprep.mubr.msk.bf16.mxu0 %vm154_vm0, %v739_v30 }
 0x1b5   :  { %vm654_vm13 = vcmp.ge.f32.partialorder %v572_v34, 0.0  ;;  %v686_v37 = vmul.f32 0.01, %v572_v34  ;;  %v564_v38 = vadd.f32 %v1799_v39, %v563_v35  ;;  %1591 = vmatmul.mubr.msk.bf16.gmra.mxu0 %vm154_vm0, %v740_v33  ;;  %v715_v45 = vsel %vm651_vm14, %v561_v29, %v683_v36 }
 0x1b6   :  { %v1564_v41 = vpop.f32.mrf.mxu1 }
 0x1b7   :  { %vm652_vm1 = vcmp.ge.f32.partialorder %v564_v38, 0.0  ;;  %v684_v42 = vmul.f32 0.01, %v564_v38  ;;  %v718_v43 = vsel %vm654_vm13, %v572_v34, %v686_v37  ;;  %v585_v50 = vadd.f32 %v1564_v41, %v1799_v39 }
 0x1b8   :  { %v576_v44 = vpop.f32.mrf.mxu1  ;;  %v742_v52 = vpack.c.bf16 %v718_v43, %v717_v48 }
 0x1b9   :  { %v716_v46 = vsel %vm652_vm1, %v564_v38, %v684_v42  ;;  %v577_v47 = vadd.f32 %v1799_v39, %v576_v44  ;;  %v689_v58 = vmul.f32 0.01, %v585_v50  ;;  %vm657_vm4 = vcmp.ge.f32.partialorder %v585_v50, 0.0 }
 0x1ba   :  { %v741_v49 = vpack.c.bf16 %v716_v46, %v715_v45  ;;  %v1565_v51 = vpop.f32.mrf.mxu1 }
 0x1bb   :  { %v588_v53 = vadd.f32 %v1565_v51, %v1799_v39  ;;  %v687_v55 = vmul.f32 0.01, %v577_v47  ;;  %vm655_vm3 = vcmp.ge.f32.partialorder %v577_v47, 0.0  ;;  %v721_v2 = vsel %vm657_vm4, %v585_v50, %v689_v58 }
 0x1bc   :  { %v579_v54 = vpop.f32.mrf.mxu1  ;;  %1594 = vmatprep.mubr.msk.bf16.mxu0 %vm154_vm0, %v741_v49 }
 0x1bd   :  { %vm658_vm2 = vcmp.ge.f32.partialorder %v588_v53, 0.0  ;;  %v690_v56 = vmul.f32 0.01, %v588_v53  ;;  %v580_v57 = vadd.f32 %v1799_v39, %v579_v54  ;;  %1595 = vmatmul.mubr.msk.bf16.gmra.mxu0 %vm154_vm0, %v742_v52  ;;  %v719_v63 = vsel %vm655_vm3, %v577_v47, %v687_v55 }
 0x1be   :  { %v1568_v59 = vpop.f32.mrf.mxu1  ;;  %vm978_vm3 = vcmask 64512  }
 0x1bf   :  { %vm656_vm5 = vcmp.ge.f32.partialorder %v580_v57, 0.0  ;;  %v688_v60 = vmul.f32 0.01, %v580_v57  ;;  %v722_v61 = vsel %vm658_vm2, %v588_v53, %v690_v56  ;;  %v601_v4 = vadd.f32 %v1568_v59, %v1799_v39 }
 0x1c0   :  { %v592_v62 = vpop.f32.mrf.mxu1  ;;  %v744_v6 = vpack.c.bf16 %v722_v61, %v721_v2 }
 0x1c1   :  { %v720_v0 = vsel %vm656_vm5, %v580_v57, %v688_v60  ;;  %v593_v1 = vadd.f32 %v1799_v39, %v592_v62  ;;  %v693_v12 = vmul.f32 0.01, %v601_v4  ;;  %vm661_vm8 = vcmp.ge.f32.partialorder %v601_v4, 0.0 }
 0x1c2   :  { %v743_v3 = vpack.c.bf16 %v720_v0, %v719_v63  ;;  %v1569_v5 = vpop.f32.mrf.mxu1 }
 0x1c3   :  { %v604_v7 = vadd.f32 %v1569_v5, %v1799_v39  ;;  %v691_v9 = vmul.f32 0.01, %v593_v1  ;;  %vm659_vm7 = vcmp.ge.f32.partialorder %v593_v1, 0.0  ;;  %v725_v20 = vsel %vm661_vm8, %v601_v4, %v693_v12 }
 0x1c4   :  { %v595_v8 = vpop.f32.mrf.mxu1  ;;  %1598 = vmatprep.mubr.msk.bf16.mxu0 %vm154_vm0, %v743_v3 }
 0x1c5   :  { %vm662_vm6 = vcmp.ge.f32.partialorder %v604_v7, 0.0  ;;  %v694_v10 = vmul.f32 0.01, %v604_v7  ;;  %v596_v11 = vadd.f32 %v1799_v39, %v595_v8  ;;  %1599 = vmatmul.mubr.msk.bf16.gmra.mxu0 %vm154_vm0, %v744_v6  ;;  %v723_v17 = vsel %vm659_vm7, %v593_v1, %v691_v9 }
 0x1c6   :  { %v1572_v13 = vpop.f32.mrf.mxu1 }
 0x1c7   :  { %vm660_vm9 = vcmp.ge.f32.partialorder %v596_v11, 0.0  ;;  %v692_v14 = vmul.f32 0.01, %v596_v11  ;;  %v726_v15 = vsel %vm662_vm6, %v604_v7, %v694_v10  ;;  %v617_v22 = vadd.f32 %v1572_v13, %v1799_v39 }
 0x1c8   :  { %v608_v16 = vpop.f32.mrf.mxu1  ;;  %v746_v25 = vpack.c.bf16 %v726_v15, %v725_v20 }
 0x1c9   :  { %v724_v18 = vsel %vm660_vm9, %v596_v11, %v692_v14  ;;  %v609_v19 = vadd.f32 %v1799_v39, %v608_v16  ;;  %v697_v30 = vmul.f32 0.01, %v617_v22  ;;  %vm665_vm12 = vcmp.ge.f32.partialorder %v617_v22, 0.0 }
 0x1ca   :  { %v745_v21 = vpack.c.bf16 %v724_v18, %v723_v17  ;;  %v1573_v23 = vpop.f32.mrf.mxu1  ;;  %v1668_v18 = vmov 8  }
 0x1cb   :  { %v620_v26 = vadd.f32 %v1573_v23, %v1799_v39  ;;  %v695_v28 = vmul.f32 0.01, %v609_v19  ;;  %vm663_vm11 = vcmp.ge.f32.partialorder %v609_v19, 0.0  ;;  %v729_v38 = vsel %vm665_vm12, %v617_v22, %v697_v30  ;;  %1622 = vset.pattern.permute.xlu1 %v1668_v18  ;;  %1623 = vset.pattern.permute.xlu0 %v1668_v18 }
 0x1cc   :  { %v611_v27 = vpop.f32.mrf.mxu1  ;;  %1602 = vmatprep.mubr.msk.bf16.mxu0 %vm154_vm0, %v745_v21 }
 0x1cd   :  { %vm666_vm10 = vcmp.ge.f32.partialorder %v620_v26, 0.0  ;;  %v698_v29 = vmul.f32 0.01, %v620_v26  ;;  %v612_v24 = vadd.f32 %v1799_v39, %v611_v27  ;;  %1603 = vmatmul.mubr.msk.bf16.gmra.mxu0 %vm154_vm0, %v746_v25  ;;  %v727_v35 = vsel %vm663_vm11, %v609_v19, %v695_v28 }
 0x1ce   :  { %v1576_v31 = vpop.f32.mrf.mxu1 }
 0x1cf   :  { %vm664_vm13 = vcmp.ge.f32.partialorder %v612_v24, 0.0  ;;  %v696_v32 = vmul.f32 0.01, %v612_v24  ;;  %v730_v33 = vsel %vm666_vm10, %v620_v26, %v698_v29  ;;  %v633_v41 = vadd.f32 %v1576_v31, %v1799_v39 }
 0x1d0   :  { %v624_v34 = vpop.f32.mrf.mxu1  ;;  %v748_v43 = vpack.c.bf16 %v730_v33, %v729_v38 }
 0x1d1   :  { %v728_v36 = vsel %vm664_vm13, %v612_v24, %v696_v32  ;;  %v625_v37 = vadd.f32 %v1799_v39, %v624_v34  ;;  %v701_v49 = vmul.f32 0.01, %v633_v41  ;;  %vm669_vm1 = vcmp.ge.f32.partialorder %v633_v41, 0.0 }
 0x1d2   :  { %v747_v40 = vpack.c.bf16 %v728_v36, %v727_v35  ;;  %v1577_v42 = vpop.f32.mrf.mxu1 }
 0x1d3   :  { %v636_v44 = vadd.f32 %v1577_v42, %v1799_v39  ;;  %v699_v46 = vmul.f32 0.01, %v625_v37  ;;  %vm667_vm15 = vcmp.ge.f32.partialorder %v625_v37, 0.0  ;;  %v733_v54 = vsel %vm669_vm1, %v633_v41, %v701_v49 }
 0x1d4   :  { %v627_v45 = vpop.f32.mrf.mxu1  ;;  %1606 = vmatprep.mubr.msk.bf16.mxu0 %vm154_vm0, %v747_v40 }
 0x1d5   :  { %vm670_vm14 = vcmp.ge.f32.partialorder %v636_v44, 0.0  ;;  %v702_v47 = vmul.f32 0.01, %v636_v44  ;;  %v628_v48 = vadd.f32 %v1799_v39, %v627_v45  ;;  %1607 = vmatmul.mubr.msk.bf16.gmra.mxu0 %vm154_vm0, %v748_v43  ;;  %v731_v52 = vsel %vm667_vm15, %v625_v37, %v699_v46  ;;  %v1852_v39 = vld [vmem:[%s2083_s2 + $0x1] ss:$0 sm:$0xff]  ;;  %s1669_s2 = smov [#allocation2]  }
 0x1d6   :  { %s1369_s4 = sshll.u32 %s1669_s2, 4  ;;  %s1370_s4 = int_to_ptr.vmem [resolvable:$true] %s1369_s4 }
 0x1d7   :  { %vm668_vm2 = vcmp.ge.f32.partialorder %v628_v48, 0.0  ;;  %v700_v50 = vmul.f32 0.01, %v628_v48  ;;  %v734_v51 = vsel %vm670_vm14, %v636_v44, %v702_v47  ;;  %s1646_s5 = scalar_lea.vmem %s1370_s4, 4096  ;;  %p1651_p1 = scmp.lt.s32.totalorder %s1370_s4, %s1370_s4 }
 0x1d8   :  { %v750_v56 = vpack.c.bf16 %v734_v51, %v733_v54  ;;  %p1647_p0 = scmp.ne.s32.totalorder %s1370_s4, %s1646_s5  ;;  %p1652_p2 = scmp.lt.s32.totalorder %s1646_s5, %s1646_s5 }
 0x1d9   :  { %v732_v53 = vsel %vm668_vm2, %v628_v48, %v700_v50 }
 0x1da   :  { %v749_v55 = vpack.c.bf16 %v732_v53, %v731_v52  ;;  %p1653_p3 = por %p1652_p2, %p1651_p1 }
 0x1dc   :  { %1610 = vmatprep.mubr.msk.bf16.mxu0 %vm154_vm0, %v749_v55  ;;  %p1654_p4 = pnand %p1653_p3, %p1647_p0 }
 0x1dd   :  { %1611 = vmatmul.mubr.msk.bf16.gmra.mxu0 %vm154_vm0, %v750_v56 }
 0x265   :  { %v1584_v57 = vpop.f32.mrf.mxu0 }
 0x266   :  { %v1855_v58 = vadd.f32 %v1584_v57, %v1852_v39 }
 0x267   :  { %v851_v59 = vpop.f32.mrf.mxu0 }
 0x268   :  { %v1858_v60 = vadd.f32 %v1852_v39, %v851_v59  ;;  %v985_v61 = vsel %vm978_vm3, %v1855_v58, 0.0 }
 0x269   :  { %986 = vadd.xlane.f32.xlu1 %v985_v61  ;;  %v1585_v62 = vpop.f32.mrf.mxu0 }
 0x26a   :  { %v1863_v63 = vadd.f32 %v1585_v62, %v1852_v39  ;;  %v979_v0 = vsel %vm978_vm3, %v1858_v60, 0.0 }
 0x26b   :  { %v854_v1 = vpop.f32.mrf.mxu0  ;;  %980 = vadd.xlane.f32.xlu0 %v979_v0 }
 0x26c   :  { %v1868_v2 = vadd.f32 %v1852_v39, %v854_v1  ;;  %v988_v3 = vsel %vm978_vm3, %v1863_v63, 0.0 }
 0x26d   :  { %989 = vadd.xlane.f32.xlu1 %v988_v3  ;;  %v1588_v4 = vpop.f32.mrf.mxu0 }
 0x26e   :  { %v1873_v5 = vadd.f32 %v1588_v4, %v1852_v39  ;;  %v982_v6 = vsel %vm978_vm3, %v1868_v2, 0.0 }
 0x26f   :  { %v867_v7 = vpop.f32.mrf.mxu0  ;;  %983 = vadd.xlane.f32.xlu0 %v982_v6 }
 0x270   :  { %v1878_v9 = vadd.f32 %v1852_v39, %v867_v7  ;;  %v997_v11 = vsel %vm978_vm3, %v1873_v5, 0.0 }
 0x271   :  { %v1589_v8 = vpop.f32.mrf.mxu0 }
 0x272   :  { %v1881_v10 = vadd.f32 %v1589_v8, %v1852_v39  ;;  %v991_v17 = vsel %vm978_vm3, %v1878_v9, 0.0 }
 0x273   :  { %v870_v12 = vpop.f32.mrf.mxu0  ;;  %998 = vadd.xlane.f32.xlu0 %v997_v11 }
 0x274   :  { %v1886_v13 = vadd.f32 %v1852_v39, %v870_v12  ;;  %v1000_v14 = vsel %vm978_vm3, %v1881_v10, 0.0 }
 0x275   :  { %1001 = vadd.xlane.f32.xlu1 %v1000_v14  ;;  %v1592_v15 = vpop.f32.mrf.mxu0 }
 0x276   :  { %v1891_v16 = vadd.f32 %v1592_v15, %v1852_v39  ;;  %v994_v20 = vsel %vm978_vm3, %v1886_v13, 0.0 }
 0x277   :  { %v883_v19 = vpop.f32.mrf.mxu0  ;;  %992 = vadd.xlane.f32.xlu0 %v991_v17 }
 0x278   :  { %v1898_v22 = vadd.f32 %v1852_v39, %v883_v19  ;;  %v1009_v25 = vsel %vm978_vm3, %v1891_v16, 0.0 }
 0x279   :  { %v1593_v21 = vpop.f32.mrf.mxu0  ;;  %995 = vadd.xlane.f32.xlu1 %v994_v20 }
 0x27a   :  { %v1901_v23 = vadd.f32 %v1593_v21, %v1852_v39  ;;  %v1003_v30 = vsel %vm978_vm3, %v1898_v22, 0.0 }
 0x27b   :  { %v886_v26 = vpop.f32.mrf.mxu0  ;;  %1010 = vadd.xlane.f32.xlu0 %v1009_v25 }
 0x27c   :  { %v1906_v27 = vadd.f32 %v1852_v39, %v886_v26  ;;  %v1012_v28 = vsel %vm978_vm3, %v1901_v23, 0.0 }
 0x27d   :  { %1013 = vadd.xlane.f32.xlu1 %v1012_v28  ;;  %v1596_v29 = vpop.f32.mrf.mxu0 }
 0x27e   :  { %v1911_v24 = vadd.f32 %v1596_v29, %v1852_v39  ;;  %v1006_v32 = vsel %vm978_vm3, %v1906_v27, 0.0 }
 0x27f   :  { %1004 = vadd.xlane.f32.xlu0 %v1003_v30  ;;  %v899_v31 = vpop.f32.mrf.mxu0 }
 0x280   :  { %v1918_v34 = vadd.f32 %v1852_v39, %v899_v31  ;;  %v1021_v36 = vsel %vm978_vm3, %v1911_v24, 0.0 }
 0x281   :  { %1007 = vadd.xlane.f32.xlu1 %v1006_v32  ;;  %v1597_v33 = vpop.f32.mrf.mxu0 }
 0x282   :  { %v1921_v35 = vadd.f32 %v1597_v33, %v1852_v39  ;;  %v1015_v43 = vsel %vm978_vm3, %v1918_v34, 0.0 }
 0x283   :  { %1022 = vadd.xlane.f32.xlu0 %v1021_v36  ;;  %v902_v37 = vpop.f32.mrf.mxu0 }
 0x284   :  { %v1926_v38 = vadd.f32 %v1852_v39, %v902_v37  ;;  %v1024_v40 = vsel %vm978_vm3, %v1921_v35, 0.0 }
 0x285   :  { %1025 = vadd.xlane.f32.xlu1 %v1024_v40  ;;  %v1600_v41 = vpop.f32.mrf.mxu0 }
 0x286   :  { %v1931_v42 = vadd.f32 %v1600_v41, %v1852_v39  ;;  %v1018_v45 = vsel %vm978_vm3, %v1926_v38, 0.0 }
 0x287   :  { %v915_v44 = vpop.f32.mrf.mxu0  ;;  %1016 = vadd.xlane.f32.xlu0 %v1015_v43 }
 0x288   :  { %v1938_v47 = vadd.f32 %v1852_v39, %v915_v44  ;;  %v1033_v49 = vsel %vm978_vm3, %v1931_v42, 0.0 }
 0x289   :  { %v1601_v46 = vpop.f32.mrf.mxu0  ;;  %1019 = vadd.xlane.f32.xlu1 %v1018_v45 }
 0x28a   :  { %v1941_v48 = vadd.f32 %v1601_v46, %v1852_v39  ;;  %v1027_v55 = vsel %vm978_vm3, %v1938_v47, 0.0 }
 0x28b   :  { %v918_v50 = vpop.f32.mrf.mxu0  ;;  %1034 = vadd.xlane.f32.xlu0 %v1033_v49 }
 0x28c   :  { %v1946_v51 = vadd.f32 %v1852_v39, %v918_v50  ;;  %v1036_v52 = vsel %vm978_vm3, %v1941_v48, 0.0 }
 0x28d   :  { %v1604_v53 = vpop.f32.mrf.mxu0  ;;  %1037 = vadd.xlane.f32.xlu1 %v1036_v52 }
 0x28e   :  { %v1951_v54 = vadd.f32 %v1604_v53, %v1852_v39  ;;  %v1030_v57 = vsel %vm978_vm3, %v1946_v51, 0.0 }
 0x28f   :  { %v931_v56 = vpop.f32.mrf.mxu0  ;;  %1028 = vadd.xlane.f32.xlu0 %v1027_v55 }
 0x290   :  { %v1958_v61 = vadd.f32 %v1852_v39, %v931_v56  ;;  %v1045_v0 = vsel %vm978_vm3, %v1951_v54, 0.0 }
 0x291   :  { %v1605_v59 = vpop.f32.mrf.mxu0  ;;  %1031 = vadd.xlane.f32.xlu1 %v1030_v57 }
 0x292   :  { %v1961_v62 = vadd.f32 %v1605_v59, %v1852_v39  ;;  %v1039_v8 = vsel %vm978_vm3, %v1958_v61, 0.0 }
 0x293   :  { %v934_v1 = vpop.f32.mrf.mxu0  ;;  %1046 = vadd.xlane.f32.xlu0 %v1045_v0 }
 0x294   :  { %v1966_v3 = vadd.f32 %v1852_v39, %v934_v1  ;;  %v1048_v4 = vsel %vm978_vm3, %v1961_v62, 0.0 }
 0x295   :  { %v1608_v6 = vpop.f32.mrf.mxu0  ;;  %1049 = vadd.xlane.f32.xlu1 %v1048_v4 }
 0x296   :  { %v1971_v7 = vadd.f32 %v1608_v6, %v1852_v39  ;;  %v1042_v12 = vsel %vm978_vm3, %v1966_v3, 0.0 }
 0x297   :  { %v947_v11 = vpop.f32.mrf.mxu0  ;;  %1040 = vadd.xlane.f32.xlu0 %v1039_v8 }
 0x298   :  { %v1978_v15 = vadd.f32 %v1852_v39, %v947_v11  ;;  %v1057_v18 = vsel %vm978_vm3, %v1971_v7, 0.0 }
 0x299   :  { %v1609_v14 = vpop.f32.mrf.mxu0  ;;  %1043 = vadd.xlane.f32.xlu1 %v1042_v12 }
 0x29a   :  { %v1981_v17 = vadd.f32 %v1609_v14, %v1852_v39  ;;  %v1051_v28 = vsel %vm978_vm3, %v1978_v15, 0.0 }
 0x29b   :  { %v950_v19 = vpop.f32.mrf.mxu0  ;;  %1058 = vadd.xlane.f32.xlu0 %v1057_v18 }
 0x29c   :  { %v1986_v20 = vadd.f32 %v1852_v39, %v950_v19  ;;  %v1060_v21 = vsel %vm978_vm3, %v1981_v17, 0.0 }
 0x29d   :  { %v1612_v25 = vpop.f32.mrf.mxu0  ;;  %1061 = vadd.xlane.f32.xlu1 %v1060_v21 }
 0x29e   :  { %v1991_v26 = vadd.f32 %v1612_v25, %v1852_v39  ;;  %v1054_v30 = vsel %vm978_vm3, %v1986_v20, 0.0 }
 0x29f   :  { %v963_v29 = vpop.f32.mrf.mxu0  ;;  %1052 = vadd.xlane.f32.xlu0 %v1051_v28 }
 0x2a0   :  { %v1998_v32 = vadd.f32 %v1852_v39, %v963_v29  ;;  %v1069_v36 = vsel %vm978_vm3, %v1991_v26, 0.0 }
 0x2a1   :  { %v1613_v31 = vpop.f32.mrf.mxu0  ;;  %1055 = vadd.xlane.f32.xlu1 %v1054_v30 }
 0x2a2   :  { %v2001_v33 = vadd.f32 %v1613_v31, %v1852_v39  ;;  %v1063_v43 = vsel %vm978_vm3, %v1998_v32, 0.0 }
 0x2a3   :  { %v966_v37 = vpop.f32.mrf.mxu0  ;;  %1070 = vadd.xlane.f32.xlu0 %v1069_v36 }
 0x2a4   :  { %v2006_v40 = vadd.f32 %v1852_v39, %v966_v37  ;;  %v1072_v41 = vsel %vm978_vm3, %v2001_v33, 0.0 }
 0x2a5   :  { %1073 = vadd.xlane.f32.xlu1 %v1072_v41 }
 0x2a6   :  { %v1066_v44 = vsel %vm978_vm3, %v2006_v40, 0.0 }
 0x2a7   :  { %1064 = vadd.xlane.f32.xlu0 %v1063_v43 }
 0x2a9   :  { %1067 = vadd.xlane.f32.xlu1 %v1066_v44 }
 0x2f2   :  { %v987_v45 = vpop.xlane.xlu1 %986 }
 0x2f3   :  { %v1078_v46 = vmul.f32 0.125, %v987_v45 }
 0x2f4   :  { %v981_v49 = vpop.xlane.xlu0 %980 }
 0x2f5   :  { %v1110_v50 = vsub.f32 %v1855_v58, %v1078_v46  ;;  %v1076_v52 = vmul.f32 0.125, %v981_v49 }
 0x2f6   :  { %v990_v39 = vpop.xlane.xlu1 %989 }
 0x2f7   :  { %v1108_v53 = vsub.f32 %v1858_v60, %v1076_v52  ;;  %v1079_v55 = vmul.f32 0.125, %v990_v39  ;;  %1152 = vperm.xlu1 %1622, %v1110_v50  }
 0x2f8   :  { %v984_v56 = vpop.xlane.xlu0 %983 }
 0x2f9   :  { %v1111_v57 = vsub.f32 %v1863_v63, %v1079_v55  ;;  %v1077_v59 = vmul.f32 0.125, %v984_v56  ;;  %1142 = vperm.xlu0 %1623, %v1108_v53  }
 0x2fb   :  { %1157 = vperm.xlu1 %1622, %v1111_v57   ;;  %v1109_v1 = vsub.f32 %v1868_v2, %v1077_v59 }
 0x2fc   :  { %v999_v0 = vpop.xlane.xlu0 %998 }
 0x2fd   :  { %v1082_v4 = vmul.f32 0.125, %v999_v0 }
 0x2fe   :  { %v1002_v6 = vpop.xlane.xlu1 %1001 }
 0x2ff   :  { %1147 = vperm.xlu1 %1622, %v1109_v1   ;;  %v1114_v11 = vsub.f32 %v1873_v5, %v1082_v4  ;;  %v1083_v19 = vmul.f32 0.125, %v1002_v6 }
 0x300   :  { %v993_v8 = vpop.xlane.xlu0 %992 }
 0x301   :  { %v1080_v12 = vmul.f32 0.125, %v993_v8  ;;  %v1115_v30 = vsub.f32 %v1881_v10, %v1083_v19 }
 0x302   :  { %v996_v14 = vpop.xlane.xlu1 %995 }
 0x303   :  { %1172 = vperm.xlu1 %1622, %v1114_v11   ;;  %v1112_v21 = vsub.f32 %v1878_v9, %v1080_v12  ;;  %v1081_v31 = vmul.f32 0.125, %v996_v14 }
 0x304   :  { %v1011_v18 = vpop.xlane.xlu0 %1010 }
 0x305   :  { %v1113_v44 = vsub.f32 %v1886_v13, %v1081_v31  ;;  %v1086_v45 = vmul.f32 0.125, %v1011_v18 }
 0x306   :  { %v1014_v25 = vpop.xlane.xlu1 %1013 }
 0x307   :  { %v1087_v28 = vmul.f32 0.125, %v1014_v25  ;;  %1162 = vperm.xlu1 %1622, %v1112_v21   ;;  %v1118_v39 = vsub.f32 %v1891_v16, %v1086_v45 }
 0x308   :  { %v1005_v29 = vpop.xlane.xlu0 %1004 }
 0x309   :  { %v1119_v36 = vsub.f32 %v1901_v23, %v1087_v28  ;;  %v1084_v53 = vmul.f32 0.125, %v1005_v29 }
 0x30a   :  { %v1008_v37 = vpop.xlane.xlu1 %1007 }
 0x30b   :  { %v1085_v41 = vmul.f32 0.125, %v1008_v37  ;;  %1177 = vperm.xlu1 %1622, %v1115_v30   ;;  %1197 = vperm.xlu0 %1623, %v1119_v36   ;;  %v1116_v0 = vsub.f32 %v1898_v22, %v1084_v53 }
 0x30c   :  { %v1023_v43 = vpop.xlane.xlu0 %1022 }
 0x30d   :  { %v1117_v46 = vsub.f32 %v1906_v27, %v1085_v41  ;;  %v1090_v1 = vmul.f32 0.125, %v1023_v43 }
 0x30e   :  { %v1026_v49 = vpop.xlane.xlu1 %1025 }
 0x30f   :  { %v1091_v50 = vmul.f32 0.125, %v1026_v49  ;;  %1167 = vperm.xlu1 %1622, %v1113_v44   ;;  %1187 = vperm.xlu0 %1623, %v1117_v46   ;;  %v1122_v12 = vsub.f32 %v1911_v24, %v1090_v1 }
 0x310   :  { %v1017_v52 = vpop.xlane.xlu0 %1016 }
 0x311   :  { %v1123_v55 = vsub.f32 %v1921_v35, %v1091_v50  ;;  %v1088_v14 = vmul.f32 0.125, %v1017_v52 }
 0x312   :  { %v1020_v56 = vpop.xlane.xlu1 %1019 }
 0x313   :  { %v1089_v57 = vmul.f32 0.125, %v1020_v56  ;;  %1192 = vperm.xlu1 %1622, %v1118_v39   ;;  %1217 = vperm.xlu0 %1623, %v1123_v55   ;;  %v1120_v28 = vsub.f32 %v1918_v34, %v1088_v14 }
 0x314   :  { %v1035_v59 = vpop.xlane.xlu0 %1034 }
 0x315   :  { %v1121_v4 = vsub.f32 %v1926_v38, %v1089_v57  ;;  %v1094_v29 = vmul.f32 0.125, %v1035_v59 }
 0x316   :  { %v1038_v6 = vpop.xlane.xlu1 %1037 }
 0x317   :  { %v1095_v8 = vmul.f32 0.125, %v1038_v6  ;;  %1182 = vperm.xlu1 %1622, %v1116_v0   ;;  %1207 = vperm.xlu0 %1623, %v1121_v4   ;;  %v1126_v41 = vsub.f32 %v1931_v42, %v1094_v29 }
 0x318   :  { %v1029_v11 = vpop.xlane.xlu0 %1028 }
 0x319   :  { %v1127_v18 = vsub.f32 %v1941_v48, %v1095_v8  ;;  %v1092_v43 = vmul.f32 0.125, %v1029_v11 }
 0x31a   :  { %v1032_v19 = vpop.xlane.xlu1 %1031 }
 0x31b   :  { %v1093_v21 = vmul.f32 0.125, %v1032_v19  ;;  %1212 = vperm.xlu1 %1622, %v1122_v12   ;;  %1237 = vperm.xlu0 %1623, %v1127_v18   ;;  %v1124_v50 = vsub.f32 %v1938_v47, %v1092_v43 }
 0x31c   :  { %v1047_v25 = vpop.xlane.xlu0 %1046 }
 0x31d   :  { %v1125_v30 = vsub.f32 %v1946_v51, %v1093_v21  ;;  %v1098_v52 = vmul.f32 0.125, %v1047_v25 }
 0x31e   :  { %v1050_v31 = vpop.xlane.xlu1 %1049 }
 0x31f   :  { %v1099_v36 = vmul.f32 0.125, %v1050_v31  ;;  %1227 = vperm.xlu0 %1623, %v1125_v30   ;;  %1202 = vperm.xlu1 %1622, %v1120_v28   ;;  %v1130_v57 = vsub.f32 %v1951_v54, %v1098_v52 }
 0x320   :  { %v1041_v37 = vpop.xlane.xlu0 %1040 }
 0x321   :  { %v1131_v44 = vsub.f32 %v1961_v62, %v1099_v36  ;;  %v1096_v59 = vmul.f32 0.125, %v1041_v37 }
 0x322   :  { %v1044_v45 = vpop.xlane.xlu1 %1043 }
 0x323   :  { %v1097_v46 = vmul.f32 0.125, %v1044_v45  ;;  %1257 = vperm.xlu0 %1623, %v1131_v44   ;;  %1232 = vperm.xlu1 %1622, %v1126_v41   ;;  %v1128_v8 = vsub.f32 %v1958_v61, %v1096_v59 }
 0x324   :  { %v1059_v49 = vpop.xlane.xlu0 %1058 }
 0x325   :  { %v1129_v39 = vsub.f32 %v1966_v3, %v1097_v46  ;;  %v1102_v11 = vmul.f32 0.125, %v1059_v49 }
 0x326   :  { %v1062_v53 = vpop.xlane.xlu1 %1061 }
 0x327   :  { %v1103_v55 = vmul.f32 0.125, %v1062_v53  ;;  %1247 = vperm.xlu0 %1623, %v1129_v39   ;;  %1222 = vperm.xlu1 %1622, %v1124_v50   ;;  %v1134_v18 = vsub.f32 %v1971_v7, %v1102_v11 }
 0x328   :  { %v1053_v56 = vpop.xlane.xlu0 %1052 }
 0x329   :  { %v1135_v0 = vsub.f32 %v1981_v17, %v1103_v55  ;;  %v1100_v19 = vmul.f32 0.125, %v1053_v56 }
 0x32a   :  { %v1056_v1 = vpop.xlane.xlu1 %1055 }
 0x32b   :  { %v1101_v4 = vmul.f32 0.125, %v1056_v1  ;;  %1277 = vperm.xlu0 %1623, %v1135_v0   ;;  %1252 = vperm.xlu1 %1622, %v1130_v57   ;;  %v1132_v29 = vsub.f32 %v1978_v15, %v1100_v19 }
 0x32c   :  { %v1071_v6 = vpop.xlane.xlu0 %1070 }
 0x32d   :  { %v1133_v12 = vsub.f32 %v1986_v20, %v1101_v4  ;;  %v1106_v37 = vmul.f32 0.125, %v1071_v6 }
 0x32e   :  { %v1074_v14 = vpop.xlane.xlu1 %1073 }
 0x32f   :  { %1267 = vperm.xlu0 %1623, %v1133_v12   ;;  %1242 = vperm.xlu1 %1622, %v1128_v8   ;;  %v1107_v30 = vmul.f32 0.125, %v1074_v14  ;;  %v1138_v44 = vsub.f32 %v1991_v26, %v1106_v37 }
 0x330   :  { %v1065_v21 = vpop.xlane.xlu0 %1064 }
 0x331   :  { %v1104_v31 = vmul.f32 0.125, %v1065_v21  ;;  %v1139_v41 = vsub.f32 %v2001_v33, %v1107_v30 }
 0x332   :  { %v1068_v25 = vpop.xlane.xlu1 %1067 }
 0x333   :  { %v1105_v28 = vmul.f32 0.125, %v1068_v25  ;;  %1272 = vperm.xlu1 %1622, %v1134_v18   ;;  %v1136_v43 = vsub.f32 %v1998_v32, %v1104_v31 }
 0x335   :  { %v1137_v36 = vsub.f32 %v2006_v40, %v1105_v28 }
 0x337   :  { %1287 = vperm.xlu0 %1623, %v1137_v36   ;;  %1262 = vperm.xlu1 %1622, %v1132_v29  }
 0x33b   :  { %1297 = vperm.xlu0 %1623, %v1139_v41   ;;  %1282 = vperm.xlu1 %1622, %v1136_v43  }
 0x33f   :  { %1292 = vperm.xlu1 %1622, %v1138_v44  }
 0x372   :  { %v1153_v45 = vpop.permute.xlu1 %1152 }
 0x373   :  { %v1302_v46 = vadd.f32 %v1153_v45, %v1855_v58 }
 0x374   :  { %v1143_v49 = vpop.permute.xlu0 %1142 }
 0x375   :  { %1334 = vst [vmem:[#allocation2 + $0x10] sm:$0xff] %v1302_v46  ;;  %v1300_v50 = vadd.f32 %v1143_v49, %v1858_v60 }
 0x376   :  { %v1158_v52 = vpop.permute.xlu1 %1157 }
 0x377   :  { %1332 = vst [vmem:[#allocation2] sm:$0xff] %v1300_v50  ;;  %v1303_v39 = vadd.f32 %v1158_v52, %v1863_v63 }
 0x379   :  { %1335 = vst [vmem:[#allocation2 + $0x18] sm:$0xff] %v1303_v39 }
 0x37a   :  { %v1148_v53 = vpop.permute.xlu1 %1147 }
 0x37b   :  { %v1301_v55 = vadd.f32 %v1148_v53, %v1868_v2 }
 0x37d   :  { %1333 = vst [vmem:[#allocation2 + $0x8] sm:$0xff] %v1301_v55 }
 0x37e   :  { %v1173_v56 = vpop.permute.xlu1 %1172 }
 0x37f   :  { %v1306_v57 = vadd.f32 %v1173_v56, %v1873_v5 }
 0x381   :  { %1338 = vst [vmem:[#allocation2 + $0x30] sm:$0xff] %v1306_v57 }
 0x382   :  { %v1163_v59 = vpop.permute.xlu1 %1162 }
 0x383   :  { %v1304_v58 = vadd.f32 %v1163_v59, %v1878_v9 }
 0x385   :  { %1336 = vst [vmem:[#allocation2 + $0x20] sm:$0xff] %v1304_v58 }
 0x386   :  { %v1178_v0 = vpop.permute.xlu1 %1177  ;;  %v1198_v1 = vpop.permute.xlu0 %1197 }
 0x387   :  { %v1307_v60 = vadd.f32 %v1178_v0, %v1881_v10  ;;  %v1311_v4 = vadd.f32 %v1198_v1, %v1901_v23 }
 0x389   :  { %1339 = vst [vmem:[#allocation2 + $0x38] sm:$0xff] %v1307_v60  ;;  %1343 = vst [vmem:[#allocation2 + $0x58] sm:$0xff] %v1311_v4 }
 0x38a   :  { %v1168_v63 = vpop.permute.xlu1 %1167  ;;  %v1188_v6 = vpop.permute.xlu0 %1187 }
 0x38b   :  { %v1305_v2 = vadd.f32 %v1168_v63, %v1886_v13  ;;  %v1309_v8 = vadd.f32 %v1188_v6, %v1906_v27 }
 0x38d   :  { %1337 = vst [vmem:[#allocation2 + $0x28] sm:$0xff] %v1305_v2  ;;  %1341 = vst [vmem:[#allocation2 + $0x48] sm:$0xff] %v1309_v8 }
 0x38e   :  { %v1193_v5 = vpop.permute.xlu1 %1192  ;;  %v1218_v11 = vpop.permute.xlu0 %1217 }
 0x38f   :  { %v1310_v9 = vadd.f32 %v1193_v5, %v1891_v16  ;;  %v1315_v12 = vadd.f32 %v1218_v11, %v1921_v35 }
 0x391   :  { %1342 = vst [vmem:[#allocation2 + $0x50] sm:$0xff] %v1310_v9  ;;  %1347 = vst [vmem:[#allocation2 + $0x78] sm:$0xff] %v1315_v12 }
 0x392   :  { %v1183_v10 = vpop.permute.xlu1 %1182  ;;  %v1208_v23 = vpop.permute.xlu0 %1207 }
 0x393   :  { %v1308_v14 = vadd.f32 %v1183_v10, %v1898_v22  ;;  %v1313_v18 = vadd.f32 %v1208_v23, %v1926_v38 }
 0x395   :  { %1340 = vst [vmem:[#allocation2 + $0x40] sm:$0xff] %v1308_v14  ;;  %1345 = vst [vmem:[#allocation2 + $0x68] sm:$0xff] %v1313_v18 }
 0x396   :  { %v1213_v13 = vpop.permute.xlu1 %1212  ;;  %v1238_v27 = vpop.permute.xlu0 %1237 }
 0x397   :  { %v1314_v19 = vadd.f32 %v1213_v13, %v1911_v24  ;;  %v1319_v21 = vadd.f32 %v1238_v27, %v1941_v48 }
 0x399   :  { %1346 = vst [vmem:[#allocation2 + $0x70] sm:$0xff] %v1314_v19  ;;  %1351 = vst [vmem:[#allocation2 + $0x98] sm:$0xff] %v1319_v21 }
 0x39a   :  { %v1203_v16 = vpop.permute.xlu1 %1202  ;;  %v1228_v35 = vpop.permute.xlu0 %1227 }
 0x39b   :  { %v1312_v25 = vadd.f32 %v1203_v16, %v1918_v34  ;;  %v1317_v28 = vadd.f32 %v1228_v35, %v1946_v51 }
 0x39d   :  { %1344 = vst [vmem:[#allocation2 + $0x60] sm:$0xff] %v1312_v25  ;;  %1349 = vst [vmem:[#allocation2 + $0x88] sm:$0xff] %v1317_v28 }
 0x39e   :  { %v1233_v22 = vpop.permute.xlu1 %1232  ;;  %v1258_v38 = vpop.permute.xlu0 %1257 }
 0x39f   :  { %v1318_v29 = vadd.f32 %v1233_v22, %v1931_v42  ;;  %v1323_v30 = vadd.f32 %v1258_v38, %v1961_v62 }
 0x3a1   :  { %1350 = vst [vmem:[#allocation2 + $0x90] sm:$0xff] %v1318_v29  ;;  %1355 = vst [vmem:[#allocation2 + $0xb8] sm:$0xff] %v1323_v30 }
 0x3a2   :  { %v1223_v24 = vpop.permute.xlu1 %1222  ;;  %v1248_v48 = vpop.permute.xlu0 %1247 }
 0x3a3   :  { %v1316_v31 = vadd.f32 %v1223_v24, %v1938_v47  ;;  %v1321_v36 = vadd.f32 %v1248_v48, %v1966_v3 }
 0x3a5   :  { %1348 = vst [vmem:[#allocation2 + $0x80] sm:$0xff] %v1316_v31  ;;  %1353 = vst [vmem:[#allocation2 + $0xa8] sm:$0xff] %v1321_v36 }
 0x3a6   :  { %v1253_v34 = vpop.permute.xlu1 %1252  ;;  %v1278_v51 = vpop.permute.xlu0 %1277 }
 0x3a7   :  { %v1322_v37 = vadd.f32 %v1253_v34, %v1951_v54  ;;  %v1327_v41 = vadd.f32 %v1278_v51, %v1981_v17 }
 0x3a9   :  { %1354 = vst [vmem:[#allocation2 + $0xb0] sm:$0xff] %v1322_v37  ;;  %1359 = vst [vmem:[#allocation2 + $0xd8] sm:$0xff] %v1327_v41 }
 0x3aa   :  { %v1243_v42 = vpop.permute.xlu1 %1242  ;;  %v1268_v62 = vpop.permute.xlu0 %1267 }
 0x3ab   :  { %v1320_v43 = vadd.f32 %v1243_v42, %v1958_v61  ;;  %v1325_v44 = vadd.f32 %v1268_v62, %v1986_v20 }
 0x3ad   :  { %1352 = vst [vmem:[#allocation2 + $0xa0] sm:$0xff] %v1320_v43  ;;  %1357 = vst [vmem:[#allocation2 + $0xc8] sm:$0xff] %v1325_v44 }
 0x3ae   :  { %v1273_v47 = vpop.permute.xlu1 %1272 }
 0x3af   :  { %v1326_v3 = vadd.f32 %v1273_v47, %v1971_v7 }
 0x3b1   :  { %1358 = vst [vmem:[#allocation2 + $0xd0] sm:$0xff] %v1326_v3 }
 0x3b2   :  { %v1263_v45 = vpop.permute.xlu1 %1262  ;;  %v1288_v46 = vpop.permute.xlu0 %1287 }
 0x3b3   :  { %v1324_v54 = vadd.f32 %v1263_v45, %v1978_v15  ;;  %v1329_v17 = vadd.f32 %v1288_v46, %v2006_v40 }
 0x3b5   :  { %1356 = vst [vmem:[#allocation2 + $0xc0] sm:$0xff] %v1324_v54  ;;  %1361 = vst [vmem:[#allocation2 + $0xe8] sm:$0xff] %v1329_v17 }
 0x3b6   :  { %v1283_v49 = vpop.permute.xlu1 %1282  ;;  %v1298_v50 = vpop.permute.xlu0 %1297 }
 0x3b7   :  { %v1328_v61 = vadd.f32 %v1283_v49, %v1998_v32  ;;  %v1331_v20 = vadd.f32 %v1298_v50, %v2001_v33 }
 0x3b9   :  { %1360 = vst [vmem:[#allocation2 + $0xe0] sm:$0xff] %v1328_v61  ;;  %1363 = vst [vmem:[#allocation2 + $0xf8] sm:$0xff] %v1331_v20 }
 0x3ba   :  { %v1293_v7 = vpop.permute.xlu1 %1292 }
 0x3bb   :  { %v1330_v52 = vadd.f32 %v1293_v7, %v1991_v26 }
 0x3bd   :  { %1362 = vst [vmem:[#allocation2 + $0xf0] sm:$0xff] %v1330_v52 }
 0x3be   :  { %1657 = shalt.err (!%p1654_p4)
}
 0x3bf   :  { %s1670_s6 = smov 128   ;;  %s1671_s7 = smov 8  }
 0x3c0   :  { %1375 = dma.vmem_to_hbm [thread:$0]  %s1370_s4, 4096, %s2084_s3, [#allocation3], %s1670_s6, %s1670_s6, %s1671_s7  }
 0x3c1   :  { %1666 = dma.done.wait [#allocation3], 4096  }
 0x3c2   :  { %1667 = vsyncadd [#allocation3], 4294963200 }
 0x3c3   :  { %1379 = vsyncpa [#allocation3], 1 }

</bundles_post_ra>
